<compile_context>
chip_gen: v5e
topology: v5e:2x2
jax: 0.10.0
libtpu: 0.0.40
codegen_flags: <defaults>
</compile_context>

<pallas_src>
from math import ceil

import jax
import jax.numpy as jnp
from jax.experimental import pallas as pl
from jax.experimental.pallas import tpu as pltpu


LANE = 128      # lane width: hidden dim padded to this (weights only, one-time)
SUBLANE = 8     # sublane width: batch tile must be a multiple of this


def _round_up(n, m):
    return ((n + m - 1) // m) * m


# ----------------------------------------------------------------------------
# Kernel: fused encoder + decoder (both matmuls + biases + sigmoids).
# x/out are tiled over the batch dim; weights/biases are VMEM-resident.
# ----------------------------------------------------------------------------
def _autoencoder_kernel(x_ref, w1_ref, b1_ref, w2_ref, b2_ref, o_ref):
    def sigmoid(z):
        # Stable identity sigmoid(z) = 0.5*(tanh(z/2)+1): single EUP op,
        # saturates cleanly for large |z| (no exp overflow / approx-recip NaN).
        return 0.5 * (jnp.tanh(z * 0.5) + 1.0)

    cdt = w1_ref.dtype                   # MXU operand dtype (f32, or bf16 fast path)
    x = x_ref[...].astype(cdt)           # no-op when params are f32 (v5e-friendly)

    # encoder: sigmoid(x @ W1 + b1)   (f32 accumulation on the MXU)
    h = jnp.dot(x, w1_ref[...], preferred_element_type=jnp.float32)
    h = sigmoid(h + b1_ref[...])         # (TB, Hp) + (1, Hp), f32

    # decoder: sigmoid(h @ W2 + b2)
    y = jnp.dot(h.astype(cdt), w2_ref[...], preferred_element_type=jnp.float32)
    o_ref[...] = sigmoid(y + b2_ref[...]).astype(o_ref.dtype)


# ----------------------------------------------------------------------------
# One-time parameter preparation: transpose to (in, out); pad ONLY the hidden
# dim to a lane multiple (free, weights-only); cast weights to the MXU operand
# dtype.  Biases stay f32.
# ----------------------------------------------------------------------------
def prepare_params(w1, b1, w2, b2, *, param_dtype=jnp.float32):
    """w1: (H, D), b1: (H,), w2: (D, H), b2: (D,) -- PyTorch (out, in) layout."""
    H, D = w1.shape
    Hp = _round_up(H, LANE)
    w1p = jnp.zeros((D, Hp), param_dtype).at[:, :H].set(w1.T.astype(param_dtype))
    b1p = jnp.zeros((1, Hp), jnp.float32).at[0, :H].set(b1.astype(jnp.float32))
    w2p = jnp.zeros((Hp, D), param_dtype).at[:H, :].set(w2.T.astype(param_dtype))
    b2p = b2.astype(jnp.float32).reshape(1, D)
    return {"w1": w1p, "b1": b1p, "w2": w2p, "b2": b2p, "D": D, "H": H, "Hp": Hp}


def _in_specs(TB, D, Hp, resident_kw):
    return [
        pl.BlockSpec((TB, D), lambda i: (i, 0)),                  # x batch tile
        pl.BlockSpec((D, Hp), lambda i: (0, 0), **resident_kw),   # W1 (resident)
        pl.BlockSpec((1, Hp), lambda i: (0, 0), **resident_kw),   # b1 (resident)
        pl.BlockSpec((Hp, D), lambda i: (0, 0), **resident_kw),   # W2 (resident)
        pl.BlockSpec((1, D), lambda i: (0, 0), **resident_kw),    # b2 (resident)
    ]


def net_forward(x, params, *, block_b=1024, out_dtype=None):
    """x: (B, D). params: output of prepare_params."""
    B, D = x.shape
    assert D == params["D"], "feature dim mismatch"
    Hp = params["Hp"]
    out_dtype = x.dtype if out_dtype is None else jnp.dtype(out_dtype)

    # Batch tile: multiple of 8, capped at block_b; aim for an EVEN tile count
    # (>= 2) so the "parallel" batch axis populates both v7x TensorCores.
    if B <= SUBLANE:
        TB = SUBLANE
    else:
        n_pairs = max(pl.cdiv(B, 2 * block_b), 1)
        TB = min(block_b, _round_up(pl.cdiv(B, 2 * n_pairs), SUBLANE))
        TB = max(TB, SUBLANE)
    grid = (pl.cdiv(B, TB),)   # partial tail tile: Pallas masks the store

    xbytes = jnp.dtype(x.dtype).itemsize
    wbytes = jnp.dtype(params["w1"].dtype).itemsize
    obytes = jnp.dtype(out_dtype).itemsize

    # Honest cost hint (true B/D/Hp sizes, no padding).
    flops = 2 * B * (D * Hp + Hp * D)
    transc = B * (Hp + D)                                   # one tanh per activation
    bytes_accessed = (B * D * xbytes                        # x
                      + (D * Hp + Hp * D) * wbytes          # weights (once)
                      + (Hp + D) * 4                        # biases
                      + B * D * obytes)                     # out

    # VMEM budget: double-buffered x/out tiles, resident weights/biases,
    # plus the (TB, Hp) f32 hidden intermediate.  Tiny; clamp well under the
    # 32 MiB scoped default (per-TC) so it is safe on v5e/v6e/v7x alike.
    vmem_need = (2 * TB * D * xbytes + 2 * TB * D * obytes
                 + (D * Hp + Hp * D) * wbytes + (Hp + D) * 4
                 + TB * Hp * 4)
    vmem_limit = int(min(max(4 * vmem_need, 8 << 20), 32 << 20))

    def _call(resident_kw):
        return pl.pallas_call(
            _autoencoder_kernel,
            out_shape=jax.ShapeDtypeStruct((B, D), out_dtype),
            grid=grid,
            in_specs=_in_specs(TB, D, Hp, resident_kw),
            out_specs=pl.BlockSpec((TB, D), lambda i: (i, 0)),
            compiler_params=pltpu.CompilerParams(
                dimension_semantics=("parallel",),
                vmem_limit_bytes=vmem_limit,
            ),
            cost_estimate=pl.CostEstimate(
                flops=flops, transcendentals=transc,
                bytes_accessed=bytes_accessed),
        )(x, params["w1"], params["b1"], params["w2"], params["b2"])

    try:
        # Weights/biases have constant index_maps (fetched once, revisited):
        # single-buffer them to save VMEM headroom as D/H/TB grow.
        return _call({"pipeline_mode": pl.Buffered(1)})
    except Exception:
        # Fallback for jax builds without pipeline_mode support; default
        # double-buffering only costs a few tens of KiB at these sizes.
        return _call({})


# ----------------------------------------------------------------------------
# Init / reference (PyTorch nn.Linear convention: weight is (out, in)).
# ----------------------------------------------------------------------------
def init_params(key, input_size, hidden_ratio=0.75):
    hidden = ceil(input_size * hidden_ratio)
    k1, k2, k3, k4 = jax.random.split(key, 4)

    lim1 = 1.0 / jnp.sqrt(jnp.float32(input_size))
    w1 = jax.random.uniform(k1, (hidden, input_size), jnp.float32, -lim1, lim1)
    b1 = jax.random.uniform(k2, (hidden,), jnp.float32, -lim1, lim1)

    lim2 = 1.0 / jnp.sqrt(jnp.float32(hidden))
    w2 = jax.random.uniform(k3, (input_size, hidden), jnp.float32, -lim2, lim2)
    b2 = jax.random.uniform(k4, (input_size,), jnp.float32, -lim2, lim2)
    return w1, b1, w2, b2


def reference_forward(x, w1, b1, w2, b2):
    h = jax.nn.sigmoid(x @ w1.T + b1)
    return jax.nn.sigmoid(h @ w2.T + b2)


if __name__ == "__main__":
    input_size = 32            # feature dimension fed to the autoencoder
    key = jax.random.PRNGKey(0)
    kx1, kx2, kp = jax.random.split(key, 3)

    w1, b1, w2, b2 = init_params(kp, input_size, hidden_ratio=0.75)

    # --- f32 params, small batch (single tile) -------------------------------
    p_f32 = prepare_params(w1, b1, w2, b2, param_dtype=jnp.float32)
    x_small = jax.random.normal(kx1, (8, input_size), jnp.float32)
    out_small = jax.block_until_ready(net_forward(x_small, p_f32))
    ref_small = reference_forward(x_small, w1, b1, w2, b2)
    assert out_small.shape == x_small.shape
    assert jnp.allclose(out_small, ref_small, atol=1e-5, rtol=1e-5), \
        "f32 single-tile mismatch"

    # --- f32 params, multi-tile grid with a partial (masked) tail tile -------
    x_tail = jax.random.normal(kx2, (50, input_size), jnp.float32)
    out_tail = jax.block_until_ready(net_forward(x_tail, p_f32))
    ref_tail = reference_forward(x_tail, w1, b1, w2, b2)
    assert out_tail.shape == x_tail.shape
    assert jnp.allclose(out_tail, ref_tail, atol=1e-5, rtol=1e-5), \
        "f32 tail-tile mismatch"

    # --- bf16 MXU operands + bf16 output (v6e/v7x fast path; f32 accumulate) -
    p_bf16 = prepare_params(w1, b1, w2, b2, param_dtype=jnp.bfloat16)
    out_bf16 = jax.block_until_ready(
        net_forward(x_tail, p_bf16, out_dtype=jnp.bfloat16))
    assert out_bf16.dtype == jnp.bfloat16
    assert jnp.allclose(out_bf16.astype(jnp.float32), ref_tail,
                        atol=3e-2, rtol=3e-2), "bf16 path mismatch"

    print("KERNEL_OK")
</pallas_src>

<mosaic_0001>
module attributes {stable_mosaic.version = 11 : i64} {
  func.func @_autoencoder_kernel(%arg0: i32, %arg1: memref<8x32xf32, #tpu.memory_space<vmem>>, %arg2: memref<32x128xf32, #tpu.memory_space<vmem>>, %arg3: memref<1x128xf32, #tpu.memory_space<vmem>>, %arg4: memref<128x32xf32, #tpu.memory_space<vmem>>, %arg5: memref<1x32xf32, #tpu.memory_space<vmem>>, %arg6: memref<8x32xf32, #tpu.memory_space<vmem>>) attributes {dimension_semantics = [#tpu.dimension_semantics<parallel>], iteration_bounds = array<i64: 1>, scalar_prefetch = 0 : i64, scratch_operands = 0 : i64, tpu.core_type = #tpu.core_type<tc>, window_params = [{transform_indices = @transform_0, window_bounds = array<i64: 8, 32>}, {pipeline_mode = #tpu.pipeline_mode<synchronous>, transform_indices = @transform_1, window_bounds = array<i64: 32, 128>}, {pipeline_mode = #tpu.pipeline_mode<synchronous>, transform_indices = @transform_2, window_bounds = array<i64: 1, 128>}, {pipeline_mode = #tpu.pipeline_mode<synchronous>, transform_indices = @transform_3, window_bounds = array<i64: 128, 32>}, {pipeline_mode = #tpu.pipeline_mode<synchronous>, transform_indices = @transform_4, window_bounds = array<i64: 1, 32>}, {transform_indices = @transform_5, window_bounds = array<i64: 8, 32>}]} {
    %c0 = arith.constant 0 : index
    %c0_0 = arith.constant 0 : index
    %0 = vector.load %arg1[%c0, %c0_0] : memref<8x32xf32, #tpu.memory_space<vmem>>, vector<8x32xf32>
    %c0_1 = arith.constant 0 : index
    %c0_2 = arith.constant 0 : index
    %1 = vector.load %arg2[%c0_1, %c0_2] : memref<32x128xf32, #tpu.memory_space<vmem>>, vector<32x128xf32>
    %cst = arith.constant dense<0.000000e+00> : vector<8x128xf32>
    %2 = tpu.matmul %0, %1, %cst {dimension_numbers = #tpu.dot_dimension_numbers<[1], [0], [0], [1], [0, 0, 1, 1], [], []>} : vector<8x32xf32>, vector<32x128xf32>, vector<8x128xf32> -> vector<8x128xf32>
    %c0_3 = arith.constant 0 : index
    %c0_4 = arith.constant 0 : index
    %3 = vector.load %arg3[%c0_3, %c0_4] : memref<1x128xf32, #tpu.memory_space<vmem>>, vector<1x128xf32>
    %4 = vector.broadcast %3 : vector<1x128xf32> to vector<8x128xf32>
    %5 = arith.addf %2, %4 : vector<8x128xf32>
    %cst_5 = arith.constant 5.000000e-01 : f32
    %6 = vector.broadcast %cst_5 : f32 to vector<8x128xf32>
    %7 = arith.mulf %5, %6 : vector<8x128xf32>
    %8 = math.tanh %7 : vector<8x128xf32>
    %cst_6 = arith.constant 1.000000e+00 : f32
    %9 = vector.broadcast %cst_6 : f32 to vector<8x128xf32>
    %10 = arith.addf %8, %9 : vector<8x128xf32>
    %cst_7 = arith.constant 5.000000e-01 : f32
    %11 = vector.broadcast %cst_7 : f32 to vector<8x128xf32>
    %12 = arith.mulf %11, %10 : vector<8x128xf32>
    %c0_8 = arith.constant 0 : index
    %c0_9 = arith.constant 0 : index
    %13 = vector.load %arg4[%c0_8, %c0_9] : memref<128x32xf32, #tpu.memory_space<vmem>>, vector<128x32xf32>
    %cst_10 = arith.constant dense<0.000000e+00> : vector<8x32xf32>
    %14 = tpu.matmul %12, %13, %cst_10 {dimension_numbers = #tpu.dot_dimension_numbers<[1], [0], [0], [1], [0, 0, 1, 1], [], []>} : vector<8x128xf32>, vector<128x32xf32>, vector<8x32xf32> -> vector<8x32xf32>
    %c0_11 = arith.constant 0 : index
    %c0_12 = arith.constant 0 : index
    %15 = vector.load %arg5[%c0_11, %c0_12] : memref<1x32xf32, #tpu.memory_space<vmem>>, vector<1x32xf32>
    %16 = vector.broadcast %15 : vector<1x32xf32> to vector<8x32xf32>
    %17 = arith.addf %14, %16 : vector<8x32xf32>
    %cst_13 = arith.constant 5.000000e-01 : f32
    %18 = vector.broadcast %cst_13 : f32 to vector<8x32xf32>
    %19 = arith.mulf %17, %18 : vector<8x32xf32>
    %20 = math.tanh %19 : vector<8x32xf32>
    %cst_14 = arith.constant 1.000000e+00 : f32
    %21 = vector.broadcast %cst_14 : f32 to vector<8x32xf32>
    %22 = arith.addf %20, %21 : vector<8x32xf32>
    %cst_15 = arith.constant 5.000000e-01 : f32
    %23 = vector.broadcast %cst_15 : f32 to vector<8x32xf32>
    %24 = arith.mulf %23, %22 : vector<8x32xf32>
    %c0_16 = arith.constant 0 : index
    %c0_17 = arith.constant 0 : index
    %25 = vector.load %arg6[%c0_16, %c0_17] : memref<8x32xf32, #tpu.memory_space<vmem>>, vector<8x32xf32>
    tpu.vector_store %arg6[%c0_16, %c0_17], %24 {strides = array<i32>} : memref<8x32xf32, #tpu.memory_space<vmem>>, vector<8x32xf32>,
    return
  }
  func.func @transform_0(%arg0: i32) -> (i32, i32) {
    %c0_i32 = arith.constant 0 : i32
    %c0_i32_0 = arith.constant 0 : i32
    return %arg0, %c0_i32 : i32, i32
  }
  func.func @transform_1(%arg0: i32) -> (i32, i32) {
    %c0_i32 = arith.constant 0 : i32
    %c0_i32_0 = arith.constant 0 : i32
    %c0_i32_1 = arith.constant 0 : i32
    return %c0_i32, %c0_i32_0 : i32, i32
  }
  func.func @transform_2(%arg0: i32) -> (i32, i32) {
    %c0_i32 = arith.constant 0 : i32
    %c0_i32_0 = arith.constant 0 : i32
    %c0_i32_1 = arith.constant 0 : i32
    return %c0_i32, %c0_i32_0 : i32, i32
  }
  func.func @transform_3(%arg0: i32) -> (i32, i32) {
    %c0_i32 = arith.constant 0 : i32
    %c0_i32_0 = arith.constant 0 : i32
    %c0_i32_1 = arith.constant 0 : i32
    return %c0_i32, %c0_i32_0 : i32, i32
  }
  func.func @transform_4(%arg0: i32) -> (i32, i32) {
    %c0_i32 = arith.constant 0 : i32
    %c0_i32_0 = arith.constant 0 : i32
    %c0_i32_1 = arith.constant 0 : i32
    return %c0_i32, %c0_i32_0 : i32, i32
  }
  func.func @transform_5(%arg0: i32) -> (i32, i32) {
    %c0_i32 = arith.constant 0 : i32
    %c0_i32_0 = arith.constant 0 : i32
    return %arg0, %c0_i32 : i32, i32
  }
}

module attributes {stable_mosaic.version = 11 : i64} {
  func.func @_autoencoder_kernel(%arg0: i32, %arg1: memref<8x32xf32, #tpu.memory_space<vmem>>, %arg2: memref<32x128xf32, #tpu.memory_space<vmem>>, %arg3: memref<1x128xf32, #tpu.memory_space<vmem>>, %arg4: memref<128x32xf32, #tpu.memory_space<vmem>>, %arg5: memref<1x32xf32, #tpu.memory_space<vmem>>, %arg6: memref<8x32xf32, #tpu.memory_space<vmem>>) attributes {dimension_semantics = [#tpu.dimension_semantics<parallel>], iteration_bounds = array<i64: 1>, scalar_prefetch = 0 : i64, scratch_operands = 0 : i64, tpu.core_type = #tpu.core_type<tc>, window_params = [{transform_indices = @transform_0, window_bounds = array<i64: 8, 32>}, {pipeline_mode = #tpu.pipeline_mode<synchronous>, transform_indices = @transform_1, window_bounds = array<i64: 32, 128>}, {pipeline_mode = #tpu.pipeline_mode<synchronous>, transform_indices = @transform_2, window_bounds = array<i64: 1, 128>}, {pipeline_mode = #tpu.pipeline_mode<synchronous>, transform_indices = @transform_3, window_bounds = array<i64: 128, 32>}, {pipeline_mode = #tpu.pipeline_mode<synchronous>, transform_indices = @transform_4, window_bounds = array<i64: 1, 32>}, {transform_indices = @transform_5, window_bounds = array<i64: 8, 32>}]} {
    %c0 = arith.constant 0 : index
    %c0_0 = arith.constant 0 : index
    %0 = vector.load %arg1[%c0, %c0_0] : memref<8x32xf32, #tpu.memory_space<vmem>>, vector<8x32xf32>
    %c0_1 = arith.constant 0 : index
    %c0_2 = arith.constant 0 : index
    %1 = vector.load %arg2[%c0_1, %c0_2] : memref<32x128xf32, #tpu.memory_space<vmem>>, vector<32x128xf32>
    %cst = arith.constant dense<0.000000e+00> : vector<8x128xf32>
    %2 = tpu.matmul %0, %1, %cst {dimension_numbers = #tpu.dot_dimension_numbers<[1], [0], [0], [1], [0, 0, 1, 1], [], []>} : vector<8x32xf32>, vector<32x128xf32>, vector<8x128xf32> -> vector<8x128xf32>
    %c0_3 = arith.constant 0 : index
    %c0_4 = arith.constant 0 : index
    %3 = vector.load %arg3[%c0_3, %c0_4] : memref<1x128xf32, #tpu.memory_space<vmem>>, vector<1x128xf32>
    %4 = vector.broadcast %3 : vector<1x128xf32> to vector<8x128xf32>
    %5 = arith.addf %2, %4 : vector<8x128xf32>
    %cst_5 = arith.constant 5.000000e-01 : f32
    %6 = vector.broadcast %cst_5 : f32 to vector<8x128xf32>
    %7 = arith.mulf %5, %6 : vector<8x128xf32>
    %8 = math.tanh %7 : vector<8x128xf32>
    %cst_6 = arith.constant 1.000000e+00 : f32
    %9 = vector.broadcast %cst_6 : f32 to vector<8x128xf32>
    %10 = arith.addf %8, %9 : vector<8x128xf32>
    %cst_7 = arith.constant 5.000000e-01 : f32
    %11 = vector.broadcast %cst_7 : f32 to vector<8x128xf32>
    %12 = arith.mulf %11, %10 : vector<8x128xf32>
    %c0_8 = arith.constant 0 : index
    %c0_9 = arith.constant 0 : index
    %13 = vector.load %arg4[%c0_8, %c0_9] : memref<128x32xf32, #tpu.memory_space<vmem>>, vector<128x32xf32>
    %cst_10 = arith.constant dense<0.000000e+00> : vector<8x32xf32>
    %14 = tpu.matmul %12, %13, %cst_10 {dimension_numbers = #tpu.dot_dimension_numbers<[1], [0], [0], [1], [0, 0, 1, 1], [], []>} : vector<8x128xf32>, vector<128x32xf32>, vector<8x32xf32> -> vector<8x32xf32>
    %c0_11 = arith.constant 0 : index
    %c0_12 = arith.constant 0 : index
    %15 = vector.load %arg5[%c0_11, %c0_12] : memref<1x32xf32, #tpu.memory_space<vmem>>, vector<1x32xf32>
    %16 = vector.broadcast %15 : vector<1x32xf32> to vector<8x32xf32>
    %17 = arith.addf %14, %16 : vector<8x32xf32>
    %cst_13 = arith.constant 5.000000e-01 : f32
    %18 = vector.broadcast %cst_13 : f32 to vector<8x32xf32>
    %19 = arith.mulf %17, %18 : vector<8x32xf32>
    %20 = math.tanh %19 : vector<8x32xf32>
    %cst_14 = arith.constant 1.000000e+00 : f32
    %21 = vector.broadcast %cst_14 : f32 to vector<8x32xf32>
    %22 = arith.addf %20, %21 : vector<8x32xf32>
    %cst_15 = arith.constant 5.000000e-01 : f32
    %23 = vector.broadcast %cst_15 : f32 to vector<8x32xf32>
    %24 = arith.mulf %23, %22 : vector<8x32xf32>
    %c0_16 = arith.constant 0 : index
    %c0_17 = arith.constant 0 : index
    %25 = vector.load %arg6[%c0_16, %c0_17] : memref<8x32xf32, #tpu.memory_space<vmem>>, vector<8x32xf32>
    tpu.vector_store %arg6[%c0_16, %c0_17], %24 {strides = array<i32>} : memref<8x32xf32, #tpu.memory_space<vmem>>, vector<8x32xf32>,
    return
  }
  func.func @transform_0(%arg0: i32) -> (i32, i32) {
    %c0_i32 = arith.constant 0 : i32
    %c0_i32_0 = arith.constant 0 : i32
    return %arg0, %c0_i32 : i32, i32
  }
  func.func @transform_1(%arg0: i32) -> (i32, i32) {
    %c0_i32 = arith.constant 0 : i32
    %c0_i32_0 = arith.constant 0 : i32
    %c0_i32_1 = arith.constant 0 : i32
    return %c0_i32, %c0_i32_0 : i32, i32
  }
  func.func @transform_2(%arg0: i32) -> (i32, i32) {
    %c0_i32 = arith.constant 0 : i32
    %c0_i32_0 = arith.constant 0 : i32
    %c0_i32_1 = arith.constant 0 : i32
    return %c0_i32, %c0_i32_0 : i32, i32
  }
  func.func @transform_3(%arg0: i32) -> (i32, i32) {
    %c0_i32 = arith.constant 0 : i32
    %c0_i32_0 = arith.constant 0 : i32
    %c0_i32_1 = arith.constant 0 : i32
    return %c0_i32, %c0_i32_0 : i32, i32
  }
  func.func @transform_4(%arg0: i32) -> (i32, i32) {
    %c0_i32 = arith.constant 0 : i32
    %c0_i32_0 = arith.constant 0 : i32
    %c0_i32_1 = arith.constant 0 : i32
    return %c0_i32, %c0_i32_0 : i32, i32
  }
  func.func @transform_5(%arg0: i32) -> (i32, i32) {
    %c0_i32 = arith.constant 0 : i32
    %c0_i32_0 = arith.constant 0 : i32
    return %arg0, %c0_i32 : i32, i32
  }
}

</mosaic_0001>

<bundles_post_ra>
// kernel: tpu_custom_call.1
= control target key start
LH: loop header
LB: loop body
LE: loop exit
PB: predicated region body
PF: predicated region fallthrough
CT: control target
= control target key end

     0   :  { %vm30_vm0 = vcmask 261120   ;;  %s258_s0 = inlined_call_operand.vmem [shape: f32[8,32], index: 0, kind: input, shape index: {}]   ;;  %s259_s1 = inlined_call_operand.vmem [shape: f32[32,128], index: 1, kind: input, shape index: {}]   ;;  %s260_s2 = inlined_call_operand.vmem [shape: f32[1,128], index: 2, kind: input, shape index: {}]   ;;  %s261_s3 = inlined_call_operand.vmem [shape: f32[128,32], index: 3, kind: input, shape index: {}]   ;;  %s262_s4 = inlined_call_operand.vmem [shape: f32[1,32], index: 4, kind: input, shape index: {}]   ;;  %s263_s5 = inlined_call_operand.hbm [shape: f32[8,32], index: 5, kind: output, shape index: {}]  }
   0x1   :  { %v25_v0 = vld [vmem:[%s259_s1 + $0x18] sm:$0xff]  ;;  %v24_v1 = vld [vmem:[%s259_s1 + $0x10] sm:$0xff]  ;;  %v23_v3 = vld [vmem:[%s259_s1 + $0x8] sm:$0xff] }
   0x2   :  { %46 = vmatpush.msra.mxu0 %v25_v0  ;;  %v73_v2 = vld [vmem:[%s261_s3 + $0x78] sm:$0xff]  ;;  %v72_v4 = vld [vmem:[%s261_s3 + $0x70] sm:$0xff]  ;;  %v71_v5 = vld [vmem:[%s261_s3 + $0x68] sm:$0xff] }
   0x3   :  { %78 = vmatpush.msra.mxu1 %v73_v2  ;;  %v22_v6 = vld [vmem:[%s259_s1] sm:$0xff] }
   0x4   :  { %47 = vmatpush.msra.mxu0 %v24_v1  ;;  %v21_v7 = vld [vmem:[%s258_s0] sm:$0xff] }
   0x5   :  { %79 = vmatpush.msra.mxu1 %v72_v4  ;;  %v70_v8 = vld [vmem:[%s261_s3 + $0x60] sm:$0xff] }
   0x6   :  { %48 = vmatpush.msra.mxu0 %v23_v3 }
   0x7   :  { %10 = vsyncpa [#allocation3], 0  ;;  %80 = vmatpush.msra.mxu1 %v71_v5  ;;  %v69_v9 = vld [vmem:[%s261_s3 + $0x58] sm:$0xff]  ;;  %v68_v10 = vld [vmem:[%s261_s3 + $0x50] sm:$0xff]  ;;  %s110_s13 = sshll.u32 %s263_s5, 4  ;;  %s111_s13 = int_to_ptr.hbm [resolvable:$true] %s110_s13 }
   0x8   :  { %49 = vmatpush.msra.mxu0 %v22_v6  ;;  %v67_v11 = vld [vmem:[%s261_s3 + $0x48] sm:$0xff]  ;;  %v66_v12 = vld [vmem:[%s261_s3 + $0x40] sm:$0xff]  ;;  %v65_v13 = vld [vmem:[%s261_s3 + $0x38] sm:$0xff] }
   0x9   :  { %119 = vmatmul.msk.f32.vlgmr.msra.gmra.mxu0 %vm30_vm0, %v21_v7  ;;  %81 = vmatpush.msra.mxu1 %v70_v8  ;;  %v64_v14 = vld [vmem:[%s261_s3 + $0x30] sm:$0xff]  ;;  %v63_v15 = vld [vmem:[%s261_s3 + $0x28] sm:$0xff]  ;;  %v62_v16 = vld [vmem:[%s261_s3 + $0x20] sm:$0xff] }
   0xa   :  { %v61_v17 = vld [vmem:[%s261_s3 + $0x18] sm:$0xff]  ;;  %v60_v18 = vld [vmem:[%s261_s3 + $0x10] sm:$0xff]  ;;  %v59_v19 = vld [vmem:[%s261_s3 + $0x8] sm:$0xff] }
   0xb   :  { %82 = vmatpush.msra.mxu1 %v69_v9  ;;  %v58_v20 = vld [vmem:[%s261_s3] sm:$0xff]  ;;  %s153_s3 = smov [#allocation2]  }
   0xc   :  { %v121_v21 = vld [vmem:[%s260_s2] ss:$0 sm:$0xff]  ;;  %s108_s12 = sshll.u32 %s153_s3, 4  ;;  %s109_s12 = int_to_ptr.vmem [resolvable:$true] %s108_s12 }
   0xd   :  { %83 = vmatpush.msra.mxu1 %v68_v10  ;;  %v122_v28 = vld [vmem:[%s262_s4] ss:$0 sm:$0xff] }
   0xf   :  { %84 = vmatpush.msra.mxu1 %v67_v11 }
  0x11   :  { %85 = vmatpush.msra.mxu1 %v66_v12 }
  0x13   :  { %86 = vmatpush.msra.mxu1 %v65_v13 }
  0x15   :  { %87 = vmatpush.msra.mxu1 %v64_v14 }
  0x17   :  { %88 = vmatpush.msra.mxu1 %v63_v15 }
  0x19   :  { %89 = vmatpush.msra.mxu1 %v62_v16 }
  0x1b   :  { %90 = vmatpush.msra.mxu1 %v61_v17 }
  0x1d   :  { %91 = vmatpush.msra.mxu1 %v60_v18 }
  0x1f   :  { %92 = vmatpush.msra.mxu1 %v59_v19 }
  0x21   :  { %93 = vmatpush.msra.mxu1 %v58_v20 }
  0x86   :  { %v51_v22 = vpop.f32.mrf.mxu0 }
  0x87   :  { %v52_v23 = vadd.f32 %v121_v21, %v51_v22 }
  0x89   :  { %v54_v24 = vmul.f32 0.5, %v52_v23 }
  0x8b   :  { %123 = vtanh.f32 %v54_v24 }
  0x91   :  { %v124_v25 = vpop.eup %123 }
  0x92   :  { %v56_v26 = vadd.f32 1.0, %v124_v25 }
  0x94   :  { %v57_v27 = vmul.f32 0.5, %v56_v26 }
  0x96   :  { %94 = vmatmul.f32.vlgmr.msra.gmra.mxu1 %v57_v27 }
 0x113   :  { %v95_v29 = vpop.f32.mrf.mxu1 }
 0x114   :  { %v96_v30 = vadd.f32 %v122_v28, %v95_v29 }
 0x116   :  { %v98_v31 = vmul.f32 0.5, %v96_v30 }
 0x118   :  { %125 = vtanh.f32 %v98_v31 }
 0x11e   :  { %v126_v32 = vpop.eup %125 }
 0x11f   :  { %v100_v33 = vadd.f32 1.0, %v126_v32 }
 0x121   :  { %v101_v34 = vmul.f32 0.5, %v100_v33 }
 0x123   :  { %102 = vst.msk [vmem:[#allocation2] sm:$0xff] %vm30_vm0, %v101_v34 }
 0x124   :  { %113 = dma.vmem_to_hbm [thread:$0]  %s109_s12, 128, %s111_s13, [#allocation3]  }
 0x125   :  { %151 = dma.done.wait [#allocation3], 128  }
 0x126   :  { %152 = vsyncadd [#allocation3], 4294967168 }
 0x127   :  { %118 = vsyncpa [#allocation3], 1 }

// kernel: tpu_custom_call.1
= control target key start
LH: loop header
LB: loop body
LE: loop exit
PB: predicated region body
PF: predicated region fallthrough
CT: control target
= control target key end

     0   :  { %vm30_vm0 = vcmask 261120   ;;  %s258_s0 = inlined_call_operand.vmem [shape: f32[8,32], index: 0, kind: input, shape index: {}]   ;;  %s259_s1 = inlined_call_operand.vmem [shape: f32[32,128], index: 1, kind: input, shape index: {}]   ;;  %s260_s2 = inlined_call_operand.vmem [shape: f32[1,128], index: 2, kind: input, shape index: {}]   ;;  %s261_s3 = inlined_call_operand.vmem [shape: f32[128,32], index: 3, kind: input, shape index: {}]   ;;  %s262_s4 = inlined_call_operand.vmem [shape: f32[1,32], index: 4, kind: input, shape index: {}]   ;;  %s263_s5 = inlined_call_operand.hbm [shape: f32[8,32], index: 5, kind: output, shape index: {}]  }
   0x1   :  { %v25_v0 = vld [vmem:[%s259_s1 + $0x18] sm:$0xff]  ;;  %v24_v1 = vld [vmem:[%s259_s1 + $0x10] sm:$0xff]  ;;  %v23_v3 = vld [vmem:[%s259_s1 + $0x8] sm:$0xff] }
   0x2   :  { %46 = vmatpush.msra.mxu0 %v25_v0  ;;  %v73_v2 = vld [vmem:[%s261_s3 + $0x78] sm:$0xff]  ;;  %v72_v4 = vld [vmem:[%s261_s3 + $0x70] sm:$0xff]  ;;  %v71_v5 = vld [vmem:[%s261_s3 + $0x68] sm:$0xff] }
   0x3   :  { %78 = vmatpush.msra.mxu1 %v73_v2  ;;  %v22_v6 = vld [vmem:[%s259_s1] sm:$0xff] }
   0x4   :  { %47 = vmatpush.msra.mxu0 %v24_v1  ;;  %v21_v7 = vld [vmem:[%s258_s0] sm:$0xff] }
   0x5   :  { %79 = vmatpush.msra.mxu1 %v72_v4  ;;  %v70_v8 = vld [vmem:[%s261_s3 + $0x60] sm:$0xff] }
   0x6   :  { %48 = vmatpush.msra.mxu0 %v23_v3 }
   0x7   :  { %10 = vsyncpa [#allocation3], 0  ;;  %80 = vmatpush.msra.mxu1 %v71_v5  ;;  %v69_v9 = vld [vmem:[%s261_s3 + $0x58] sm:$0xff]  ;;  %v68_v10 = vld [vmem:[%s261_s3 + $0x50] sm:$0xff]  ;;  %s110_s13 = sshll.u32 %s263_s5, 4  ;;  %s111_s13 = int_to_ptr.hbm [resolvable:$true] %s110_s13 }
   0x8   :  { %49 = vmatpush.msra.mxu0 %v22_v6  ;;  %v67_v11 = vld [vmem:[%s261_s3 + $0x48] sm:$0xff]  ;;  %v66_v12 = vld [vmem:[%s261_s3 + $0x40] sm:$0xff]  ;;  %v65_v13 = vld [vmem:[%s261_s3 + $0x38] sm:$0xff] }
   0x9   :  { %119 = vmatmul.msk.f32.vlgmr.msra.gmra.mxu0 %vm30_vm0, %v21_v7  ;;  %81 = vmatpush.msra.mxu1 %v70_v8  ;;  %v64_v14 = vld [vmem:[%s261_s3 + $0x30] sm:$0xff]  ;;  %v63_v15 = vld [vmem:[%s261_s3 + $0x28] sm:$0xff]  ;;  %v62_v16 = vld [vmem:[%s261_s3 + $0x20] sm:$0xff] }
   0xa   :  { %v61_v17 = vld [vmem:[%s261_s3 + $0x18] sm:$0xff]  ;;  %v60_v18 = vld [vmem:[%s261_s3 + $0x10] sm:$0xff]  ;;  %v59_v19 = vld [vmem:[%s261_s3 + $0x8] sm:$0xff] }
   0xb   :  { %82 = vmatpush.msra.mxu1 %v69_v9  ;;  %v58_v20 = vld [vmem:[%s261_s3] sm:$0xff]  ;;  %s153_s3 = smov [#allocation2]  }
   0xc   :  { %v121_v21 = vld [vmem:[%s260_s2] ss:$0 sm:$0xff]  ;;  %s108_s12 = sshll.u32 %s153_s3, 4  ;;  %s109_s12 = int_to_ptr.vmem [resolvable:$true] %s108_s12 }
   0xd   :  { %83 = vmatpush.msra.mxu1 %v68_v10  ;;  %v122_v28 = vld [vmem:[%s262_s4] ss:$0 sm:$0xff] }
   0xf   :  { %84 = vmatpush.msra.mxu1 %v67_v11 }
  0x11   :  { %85 = vmatpush.msra.mxu1 %v66_v12 }
  0x13   :  { %86 = vmatpush.msra.mxu1 %v65_v13 }
  0x15   :  { %87 = vmatpush.msra.mxu1 %v64_v14 }
  0x17   :  { %88 = vmatpush.msra.mxu1 %v63_v15 }
  0x19   :  { %89 = vmatpush.msra.mxu1 %v62_v16 }
  0x1b   :  { %90 = vmatpush.msra.mxu1 %v61_v17 }
  0x1d   :  { %91 = vmatpush.msra.mxu1 %v60_v18 }
  0x1f   :  { %92 = vmatpush.msra.mxu1 %v59_v19 }
  0x21   :  { %93 = vmatpush.msra.mxu1 %v58_v20 }
  0x86   :  { %v51_v22 = vpop.f32.mrf.mxu0 }
  0x87   :  { %v52_v23 = vadd.f32 %v121_v21, %v51_v22 }
  0x89   :  { %v54_v24 = vmul.f32 0.5, %v52_v23 }
  0x8b   :  { %123 = vtanh.f32 %v54_v24 }
  0x91   :  { %v124_v25 = vpop.eup %123 }
  0x92   :  { %v56_v26 = vadd.f32 1.0, %v124_v25 }
  0x94   :  { %v57_v27 = vmul.f32 0.5, %v56_v26 }
  0x96   :  { %94 = vmatmul.f32.vlgmr.msra.gmra.mxu1 %v57_v27 }
 0x113   :  { %v95_v29 = vpop.f32.mrf.mxu1 }
 0x114   :  { %v96_v30 = vadd.f32 %v122_v28, %v95_v29 }
 0x116   :  { %v98_v31 = vmul.f32 0.5, %v96_v30 }
 0x118   :  { %125 = vtanh.f32 %v98_v31 }
 0x11e   :  { %v126_v32 = vpop.eup %125 }
 0x11f   :  { %v100_v33 = vadd.f32 1.0, %v126_v32 }
 0x121   :  { %v101_v34 = vmul.f32 0.5, %v100_v33 }
 0x123   :  { %102 = vst.msk [vmem:[#allocation2] sm:$0xff] %vm30_vm0, %v101_v34 }
 0x124   :  { %113 = dma.vmem_to_hbm [thread:$0]  %s109_s12, 128, %s111_s13, [#allocation3]  }
 0x125   :  { %151 = dma.done.wait [#allocation3], 128  }
 0x126   :  { %152 = vsyncadd [#allocation3], 4294967168 }
 0x127   :  { %118 = vsyncpa [#allocation3], 1 }

</bundles_post_ra>
